<compile_context>
chip_gen: v7x
topology: tpu7x:2x2x1
jax: 0.10.0
libtpu: 0.0.40
codegen_flags: <defaults>
</compile_context>

<pallas_src>
import jax
import jax.numpy as jnp
import numpy as np
from jax import lax
from jax.experimental import pallas as pl
from jax.experimental.pallas import tpu as pltpu

BN_EPS = 1e-5


def _make_st_gcnn_kernel(n, c_in, c_out, m):
    """Kernel over a channel-row / (batch, t, v)-lane layout.

    x_ref    : (c_in,  n*m)      input, lanes = (batch, t, v)
    ablk_ref : (m, m)            precomputed block-diagonal graph operator
    acs_ref  : (1, n*m)          column sums of a_blk, tiled per batch (bias fold)
    w1_ref   : (c_in, c_out, 1)  gcn 1x1 conv weight (transposed for ref indexing)
    b1_ref   : (c_out, 1)        gcn conv bias
    g1_ref, be1_ref : (c_out, 1) gcn-branch BN gamma / beta
    wr_ref   : (c_in, c_out, 1)  residual 1x1 conv weight
    br_ref, gr_ref, ber_ref : (c_out, 1)
    out_ref  : (c_out, n*m)
    """
    L = n * m
    inv_cnt = 1.0 / float(L)          # BN element count per channel = N * T * V

    def conv1x1(w_ref, src):
        # (c_out,1) x (1,L) broadcast-MACs on the VPU; c_in=3 is far too small
        # to be worth an MXU matmul.
        acc = w_ref[0] * src[0:1, :]
        for j in range(1, c_in):
            acc = acc + w_ref[j] * src[j:j + 1, :]
        return acc                                            # (c_out, L)

    def batchnorm(y, gamma, beta):
        # Training-mode BatchNorm2d with two-pass batch statistics.  Each row
        # holds all N*T*V elements of a channel, so the stats are a single lane
        # reduction per row; (c_out,1) params broadcast along lanes for free.
        mean = jnp.sum(y, axis=1, keepdims=True) * inv_cnt    # (c_out, 1)
        yc = y - mean
        var = jnp.sum(yc * yc, axis=1, keepdims=True) * inv_cnt   # biased var
        scale = gamma * lax.rsqrt(var + BN_EPS)
        return yc * scale + beta

    def kernel(x_ref, ablk_ref, acs_ref, w1_ref, b1_ref, g1_ref, be1_ref,
               wr_ref, br_ref, gr_ref, ber_ref, out_ref):
        x = x_ref[...]                # (c_in, L)
        a_blk = ablk_ref[...]         # (m, m)

        # ---- graph operator first (commuted past the 1x1 conv): only c_in rows
        # go through the MXU instead of N*c_out rows.  Per-batch lane blocks are
        # 128-aligned slices, so slicing / concatenation stay vreg-aligned.
        z_parts = []
        for b in range(n):
            xb = x[:, b * m:(b + 1) * m]                      # (c_in, m)
            z_parts.append(
                jnp.dot(xb, a_blk, preferred_element_type=jnp.float32))
        z = z_parts[0] if n == 1 else jnp.concatenate(z_parts, axis=1)  # (c_in, L)

        # ---- gcn 1x1 conv on the graph-transformed activations; the conv bias
        # commutes through the graph op to  b_gcn (outer) colsum(a_blk).
        y2 = conv1x1(w1_ref, z) + b1_ref[...] * acs_ref[...]   # (c_out, L)

        # ---- main branch: BN (batch stats) -> ReLU -> Dropout(p=0) == identity
        main = jnp.maximum(batchnorm(y2, g1_ref[...], be1_ref[...]), 0.0)

        # ---- residual branch, deferred to keep peak vreg pressure low:
        # Conv1x1 + bias -> BN (only x needs to stay live until here).
        res = conv1x1(wr_ref, x) + br_ref[...]
        res = batchnorm(res, gr_ref[...], ber_ref[...])

        out_ref[...] = jnp.maximum(main + res, 0.0)             # final ReLU

    return kernel


@jax.jit
def st_gcnn_layer(x, A, w_gcn, b_gcn, gamma, beta,
                  w_res, b_res, gamma_res, beta_res):
    """Fused ST_GCNN_layer forward (training-mode BN, dropout p=0, stride=1).

    x: (N, Cin, T, V), A: (T, V, V), conv weights in PyTorch OIHW (Cout, Cin, 1, 1).
    Residual branch = Conv1x1 + BatchNorm2d (the in_channels != out_channels case).
    Returns (N, Cout, T, V).
    """
    n, c_in, t, v = x.shape
    c_out = w_gcn.shape[0]
    m = t * v
    L = n * m
    f32 = jnp.float32

    # Channel-major layout: rows = channels, lanes = (batch, t, v).  The tiny
    # wrapper transpose is layout plumbing that buys a lane-dense (c_out, N*T*V)
    # output slab and free (c, 1) per-channel broadcasts inside the kernel.
    x2d = jnp.transpose(x, (1, 0, 2, 3)).reshape(c_in, L).astype(f32)

    # Precompute the (m, m) block-diagonal graph operator from A (layer param):
    #   a_blk[t*V + v, t*V + w] = A[t, v, w]
    eye_t = jnp.eye(t, dtype=f32)
    a_blk = jnp.einsum('ts,tvw->tvsw', eye_t, A.astype(f32)).reshape(m, m)
    # Folded gcn bias: the conv bias commutes through the graph op as
    #   b_gcn (outer) colsum(a_blk); tile the colsum row once per batch block.
    a_colsum = jnp.tile(jnp.sum(a_blk, axis=0, keepdims=True), (1, n))   # (1, L)

    def col(p):
        return p.reshape(c_out, 1).astype(f32)

    def wt(w):   # OIHW (c_out, c_in, 1, 1) -> (c_in, c_out, 1) for ref indexing
        return jnp.transpose(w.reshape(c_out, c_in), (1, 0))[:, :, None].astype(f32)

    args = (
        x2d, a_blk, a_colsum,
        wt(w_gcn), col(b_gcn), col(gamma), col(beta),
        wt(w_res), col(b_res), col(gamma_res), col(beta_res),
    )

    vmem = pl.BlockSpec(memory_space=pltpu.MemorySpace.VMEM)
    out2d = pl.pallas_call(
        _make_st_gcnn_kernel(n, c_in, c_out, m),
        out_shape=jax.ShapeDtypeStruct((c_out, L), f32),
        in_specs=[vmem] * len(args),
        out_specs=vmem,
    )(*args)

    # (c_out, N*T*V) -> (N, c_out, T, V)
    return jnp.transpose(out2d.reshape(c_out, n, t, v), (1, 0, 2, 3))


def _reference(x, A, w_gcn, b_gcn, gamma, beta, w_res, b_res, gamma_res, beta_res):
    """Pure-JAX reference mirroring the PyTorch ST_GCNN_layer forward."""
    c_out, c_in = w_gcn.shape[:2]
    hi = lax.Precision.HIGHEST

    def bn_train(y, g, b):
        mean = y.mean(axis=(0, 2, 3), keepdims=True)
        var = ((y - mean) ** 2).mean(axis=(0, 2, 3), keepdims=True)
        yhat = (y - mean) * lax.rsqrt(var + BN_EPS)
        return yhat * g[None, :, None, None] + b[None, :, None, None]

    # gcn: 1x1 conv (+bias) then graph einsum.
    y = jnp.einsum('oi,nitv->notv', w_gcn.reshape(c_out, c_in), x, precision=hi)
    y = y + b_gcn[None, :, None, None]
    y = jnp.einsum('nctv,tvw->nctw', y, A, precision=hi)
    main = jnp.maximum(bn_train(y, gamma, beta), 0.0)      # BN -> ReLU -> Dropout(0)

    r = jnp.einsum('oi,nitv->notv', w_res.reshape(c_out, c_in), x, precision=hi)
    r = r + b_res[None, :, None, None]
    r = bn_train(r, gamma_res, beta_res)

    return jnp.maximum(main + r, 0.0)


if __name__ == "__main__":
    # ST_GCNN_layer(in_channels=3, out_channels=32, kernel_size=(T, 1), stride=1,
    #               dropout=0) on x:(N, 3, T, V), A:(T, V, V).
    # The einsum 'nctv,tvw->nctw' requires A.shape[0] == T == kernel_size[0].
    N, C_IN, C_OUT, T, V = 2, 3, 32, 8, 16     # T*V = 128 -> lane-aligned blocks

    key = jax.random.PRNGKey(0)
    kx, ka, kw1, kb1, kwr, kbr = jax.random.split(key, 6)

    x = jax.random.normal(kx, (N, C_IN, T, V), dtype=jnp.float32)
    A = jax.random.normal(ka, (T, V, V), dtype=jnp.float32) / np.sqrt(V)

    # Deterministic Conv2d-style uniform fan-in init; BatchNorm2d default affine.
    bound = 1.0 / np.sqrt(C_IN)
    w_gcn = jax.random.uniform(kw1, (C_OUT, C_IN, 1, 1), minval=-bound,
                               maxval=bound, dtype=jnp.float32)
    b_gcn = jax.random.uniform(kb1, (C_OUT,), minval=-bound, maxval=bound,
                               dtype=jnp.float32)
    w_res = jax.random.uniform(kwr, (C_OUT, C_IN, 1, 1), minval=-bound,
                               maxval=bound, dtype=jnp.float32)
    b_res = jax.random.uniform(kbr, (C_OUT,), minval=-bound, maxval=bound,
                               dtype=jnp.float32)
    gamma = jnp.ones((C_OUT,), jnp.float32)
    beta = jnp.zeros((C_OUT,), jnp.float32)
    gamma_r = jnp.ones((C_OUT,), jnp.float32)
    beta_r = jnp.zeros((C_OUT,), jnp.float32)

    out = st_gcnn_layer(x, A, w_gcn, b_gcn, gamma, beta,
                        w_res, b_res, gamma_r, beta_r)
    out = jax.block_until_ready(out)

    ref = _reference(x, A, w_gcn, b_gcn, gamma, beta,
                     w_res, b_res, gamma_r, beta_r)
    assert out.shape == (N, C_OUT, T, V), out.shape
    # Tolerance leaves headroom for MXU f32 multi-pass vs XLA-HIGHEST differences
    # in the K=128 graph contraction; semantic errors would show up as O(0.1-1).
    np.testing.assert_allclose(np.asarray(out), np.asarray(ref),
                               rtol=1e-3, atol=1e-3)
    print("KERNEL_OK")
</pallas_src>

<mosaic_0001>
module attributes {stable_mosaic.version = 11 : i64} {
  func.func @kernel(%arg0: memref<3x256xf32, #tpu.memory_space<vmem>>, %arg1: memref<128x128xf32, #tpu.memory_space<vmem>>, %arg2: memref<1x256xf32, #tpu.memory_space<vmem>>, %arg3: memref<3x32x1xf32, #tpu.memory_space<vmem>>, %arg4: memref<32x1xf32, #tpu.memory_space<vmem>>, %arg5: memref<32x1xf32, #tpu.memory_space<vmem>>, %arg6: memref<32x1xf32, #tpu.memory_space<vmem>>, %arg7: memref<3x32x1xf32, #tpu.memory_space<vmem>>, %arg8: memref<32x1xf32, #tpu.memory_space<vmem>>, %arg9: memref<32x1xf32, #tpu.memory_space<vmem>>, %arg10: memref<32x1xf32, #tpu.memory_space<vmem>>, %arg11: memref<32x256xf32, #tpu.memory_space<vmem>>) attributes {dimension_semantics = [], scalar_prefetch = 0 : i64, scratch_operands = 0 : i64, tpu.core_type = #tpu.core_type<tc>} {
    %c0 = arith.constant 0 : index
    %c0_0 = arith.constant 0 : index
    %0 = vector.load %arg0[%c0, %c0_0] : memref<3x256xf32, #tpu.memory_space<vmem>>, vector<3x256xf32>
    %c0_1 = arith.constant 0 : index
    %c0_2 = arith.constant 0 : index
    %1 = vector.load %arg1[%c0_1, %c0_2] : memref<128x128xf32, #tpu.memory_space<vmem>>, vector<128x128xf32>
    %2 = vector.extract_strided_slice %0 {offsets = [0, 0], sizes = [3, 128], strides = [1, 1]} : vector<3x256xf32> to vector<3x128xf32>
    %cst = arith.constant dense<0.000000e+00> : vector<3x128xf32>
    %3 = tpu.matmul %2, %1, %cst {dimension_numbers = #tpu.dot_dimension_numbers<[1], [0], [0], [1], [0, 0, 1, 1], [], []>} : vector<3x128xf32>, vector<128x128xf32>, vector<3x128xf32> -> vector<3x128xf32>
    %4 = vector.extract_strided_slice %0 {offsets = [0, 128], sizes = [3, 128], strides = [1, 1]} : vector<3x256xf32> to vector<3x128xf32>
    %cst_3 = arith.constant dense<0.000000e+00> : vector<3x128xf32>
    %5 = tpu.matmul %4, %1, %cst_3 {dimension_numbers = #tpu.dot_dimension_numbers<[1], [0], [0], [1], [0, 0, 1, 1], [], []>} : vector<3x128xf32>, vector<128x128xf32>, vector<3x128xf32> -> vector<3x128xf32>
    %6 = tpu.concatenate %3, %5 in 1 : vector<3x128xf32>, vector<3x128xf32> -> vector<3x256xf32>
    %c0_4 = arith.constant 0 : index
    %c0_5 = arith.constant 0 : index
    %c0_6 = arith.constant 0 : index
    %7 = vector.load %arg3[%c0_4, %c0_5, %c0_6] : memref<3x32x1xf32, #tpu.memory_space<vmem>>, vector<1x32x1xf32>
    %8 = vector.shape_cast %7 : vector<1x32x1xf32> to vector<32x1xf32>
    %9 = vector.extract_strided_slice %6 {offsets = [0, 0], sizes = [1, 256], strides = [1, 1]} : vector<3x256xf32> to vector<1x256xf32>
    %10 = vector.broadcast %8 : vector<32x1xf32> to vector<32x256xf32>
    %11 = vector.broadcast %9 : vector<1x256xf32> to vector<32x256xf32>
    %12 = arith.mulf %10, %11 : vector<32x256xf32>
    %c1 = arith.constant 1 : index
    %c0_7 = arith.constant 0 : index
    %c0_8 = arith.constant 0 : index
    %13 = vector.load %arg3[%c1, %c0_7, %c0_8] : memref<3x32x1xf32, #tpu.memory_space<vmem>>, vector<1x32x1xf32>
    %14 = vector.shape_cast %13 : vector<1x32x1xf32> to vector<32x1xf32>
    %15 = vector.extract_strided_slice %6 {offsets = [1, 0], sizes = [1, 256], strides = [1, 1]} : vector<3x256xf32> to vector<1x256xf32>
    %16 = vector.broadcast %14 : vector<32x1xf32> to vector<32x256xf32>
    %17 = vector.broadcast %15 : vector<1x256xf32> to vector<32x256xf32>
    %18 = arith.mulf %16, %17 : vector<32x256xf32>
    %19 = arith.addf %12, %18 : vector<32x256xf32>
    %c2 = arith.constant 2 : index
    %c0_9 = arith.constant 0 : index
    %c0_10 = arith.constant 0 : index
    %20 = vector.load %arg3[%c2, %c0_9, %c0_10] : memref<3x32x1xf32, #tpu.memory_space<vmem>>, vector<1x32x1xf32>
    %21 = vector.shape_cast %20 : vector<1x32x1xf32> to vector<32x1xf32>
    %22 = vector.extract_strided_slice %6 {offsets = [2, 0], sizes = [1, 256], strides = [1, 1]} : vector<3x256xf32> to vector<1x256xf32>
    %23 = vector.broadcast %21 : vector<32x1xf32> to vector<32x256xf32>
    %24 = vector.broadcast %22 : vector<1x256xf32> to vector<32x256xf32>
    %25 = arith.mulf %23, %24 : vector<32x256xf32>
    %26 = arith.addf %19, %25 : vector<32x256xf32>
    %c0_11 = arith.constant 0 : index
    %c0_12 = arith.constant 0 : index
    %27 = vector.load %arg4[%c0_11, %c0_12] : memref<32x1xf32, #tpu.memory_space<vmem>>, vector<32x1xf32>
    %c0_13 = arith.constant 0 : index
    %c0_14 = arith.constant 0 : index
    %28 = vector.load %arg2[%c0_13, %c0_14] : memref<1x256xf32, #tpu.memory_space<vmem>>, vector<1x256xf32>
    %29 = vector.broadcast %27 : vector<32x1xf32> to vector<32x256xf32>
    %30 = vector.broadcast %28 : vector<1x256xf32> to vector<32x256xf32>
    %31 = arith.mulf %29, %30 : vector<32x256xf32>
    %32 = arith.addf %26, %31 : vector<32x256xf32>
    %c0_15 = arith.constant 0 : index
    %c0_16 = arith.constant 0 : index
    %33 = vector.load %arg5[%c0_15, %c0_16] : memref<32x1xf32, #tpu.memory_space<vmem>>, vector<32x1xf32>
    %c0_17 = arith.constant 0 : index
    %c0_18 = arith.constant 0 : index
    %34 = vector.load %arg6[%c0_17, %c0_18] : memref<32x1xf32, #tpu.memory_space<vmem>>, vector<32x1xf32>
    %cst_19 = arith.constant dense<0.000000e+00> : vector<32xf32>
    %35 = vector.multi_reduction <add>, %32, %cst_19 [1] : vector<32x256xf32> to vector<32xf32>
    %36 = vector.shape_cast %35 : vector<32xf32> to vector<32x1xf32>
    %cst_20 = arith.constant 3.906250e-03 : f32
    %37 = vector.broadcast %cst_20 : f32 to vector<32x1xf32>
    %38 = arith.mulf %36, %37 : vector<32x1xf32>
    %39 = vector.broadcast %38 : vector<32x1xf32> to vector<32x256xf32>
    %40 = arith.subf %32, %39 : vector<32x256xf32>
    %41 = arith.mulf %40, %40 : vector<32x256xf32>
    %cst_21 = arith.constant dense<0.000000e+00> : vector<32xf32>
    %42 = vector.multi_reduction <add>, %41, %cst_21 [1] : vector<32x256xf32> to vector<32xf32>
    %43 = vector.shape_cast %42 : vector<32xf32> to vector<32x1xf32>
    %cst_22 = arith.constant 3.906250e-03 : f32
    %44 = vector.broadcast %cst_22 : f32 to vector<32x1xf32>
    %45 = arith.mulf %43, %44 : vector<32x1xf32>
    %cst_23 = arith.constant 9.99999974E-6 : f32
    %46 = vector.broadcast %cst_23 : f32 to vector<32x1xf32>
    %47 = arith.addf %45, %46 : vector<32x1xf32>
    %48 = math.rsqrt %47 : vector<32x1xf32>
    %49 = arith.mulf %33, %48 : vector<32x1xf32>
    %50 = vector.broadcast %49 : vector<32x1xf32> to vector<32x256xf32>
    %51 = arith.mulf %40, %50 : vector<32x256xf32>
    %52 = vector.broadcast %34 : vector<32x1xf32> to vector<32x256xf32>
    %53 = arith.addf %51, %52 : vector<32x256xf32>
    %cst_24 = arith.constant 0.000000e+00 : f32
    %54 = vector.broadcast %cst_24 : f32 to vector<32x256xf32>
    %55 = arith.maximumf %53, %54 : vector<32x256xf32>
    %c0_25 = arith.constant 0 : index
    %c0_26 = arith.constant 0 : index
    %c0_27 = arith.constant 0 : index
    %56 = vector.load %arg7[%c0_25, %c0_26, %c0_27] : memref<3x32x1xf32, #tpu.memory_space<vmem>>, vector<1x32x1xf32>
    %57 = vector.shape_cast %56 : vector<1x32x1xf32> to vector<32x1xf32>
    %58 = vector.extract_strided_slice %0 {offsets = [0, 0], sizes = [1, 256], strides = [1, 1]} : vector<3x256xf32> to vector<1x256xf32>
    %59 = vector.broadcast %57 : vector<32x1xf32> to vector<32x256xf32>
    %60 = vector.broadcast %58 : vector<1x256xf32> to vector<32x256xf32>
    %61 = arith.mulf %59, %60 : vector<32x256xf32>
    %c1_28 = arith.constant 1 : index
    %c0_29 = arith.constant 0 : index
    %c0_30 = arith.constant 0 : index
    %62 = vector.load %arg7[%c1_28, %c0_29, %c0_30] : memref<3x32x1xf32, #tpu.memory_space<vmem>>, vector<1x32x1xf32>
    %63 = vector.shape_cast %62 : vector<1x32x1xf32> to vector<32x1xf32>
    %64 = vector.extract_strided_slice %0 {offsets = [1, 0], sizes = [1, 256], strides = [1, 1]} : vector<3x256xf32> to vector<1x256xf32>
    %65 = vector.broadcast %63 : vector<32x1xf32> to vector<32x256xf32>
    %66 = vector.broadcast %64 : vector<1x256xf32> to vector<32x256xf32>
    %67 = arith.mulf %65, %66 : vector<32x256xf32>
    %68 = arith.addf %61, %67 : vector<32x256xf32>
    %c2_31 = arith.constant 2 : index
    %c0_32 = arith.constant 0 : index
    %c0_33 = arith.constant 0 : index
    %69 = vector.load %arg7[%c2_31, %c0_32, %c0_33] : memref<3x32x1xf32, #tpu.memory_space<vmem>>, vector<1x32x1xf32>
    %70 = vector.shape_cast %69 : vector<1x32x1xf32> to vector<32x1xf32>
    %71 = vector.extract_strided_slice %0 {offsets = [2, 0], sizes = [1, 256], strides = [1, 1]} : vector<3x256xf32> to vector<1x256xf32>
    %72 = vector.broadcast %70 : vector<32x1xf32> to vector<32x256xf32>
    %73 = vector.broadcast %71 : vector<1x256xf32> to vector<32x256xf32>
    %74 = arith.mulf %72, %73 : vector<32x256xf32>
    %75 = arith.addf %68, %74 : vector<32x256xf32>
    %c0_34 = arith.constant 0 : index
    %c0_35 = arith.constant 0 : index
    %76 = vector.load %arg8[%c0_34, %c0_35] : memref<32x1xf32, #tpu.memory_space<vmem>>, vector<32x1xf32>
    %77 = vector.broadcast %76 : vector<32x1xf32> to vector<32x256xf32>
    %78 = arith.addf %75, %77 : vector<32x256xf32>
    %c0_36 = arith.constant 0 : index
    %c0_37 = arith.constant 0 : index
    %79 = vector.load %arg9[%c0_36, %c0_37] : memref<32x1xf32, #tpu.memory_space<vmem>>, vector<32x1xf32>
    %c0_38 = arith.constant 0 : index
    %c0_39 = arith.constant 0 : index
    %80 = vector.load %arg10[%c0_38, %c0_39] : memref<32x1xf32, #tpu.memory_space<vmem>>, vector<32x1xf32>
    %cst_40 = arith.constant dense<0.000000e+00> : vector<32xf32>
    %81 = vector.multi_reduction <add>, %78, %cst_40 [1] : vector<32x256xf32> to vector<32xf32>
    %82 = vector.shape_cast %81 : vector<32xf32> to vector<32x1xf32>
    %cst_41 = arith.constant 3.906250e-03 : f32
    %83 = vector.broadcast %cst_41 : f32 to vector<32x1xf32>
    %84 = arith.mulf %82, %83 : vector<32x1xf32>
    %85 = vector.broadcast %84 : vector<32x1xf32> to vector<32x256xf32>
    %86 = arith.subf %78, %85 : vector<32x256xf32>
    %87 = arith.mulf %86, %86 : vector<32x256xf32>
    %cst_42 = arith.constant dense<0.000000e+00> : vector<32xf32>
    %88 = vector.multi_reduction <add>, %87, %cst_42 [1] : vector<32x256xf32> to vector<32xf32>
    %89 = vector.shape_cast %88 : vector<32xf32> to vector<32x1xf32>
    %cst_43 = arith.constant 3.906250e-03 : f32
    %90 = vector.broadcast %cst_43 : f32 to vector<32x1xf32>
    %91 = arith.mulf %89, %90 : vector<32x1xf32>
    %cst_44 = arith.constant 9.99999974E-6 : f32
    %92 = vector.broadcast %cst_44 : f32 to vector<32x1xf32>
    %93 = arith.addf %91, %92 : vector<32x1xf32>
    %94 = math.rsqrt %93 : vector<32x1xf32>
    %95 = arith.mulf %79, %94 : vector<32x1xf32>
    %96 = vector.broadcast %95 : vector<32x1xf32> to vector<32x256xf32>
    %97 = arith.mulf %86, %96 : vector<32x256xf32>
    %98 = vector.broadcast %80 : vector<32x1xf32> to vector<32x256xf32>
    %99 = arith.addf %97, %98 : vector<32x256xf32>
    %100 = arith.addf %55, %99 : vector<32x256xf32>
    %cst_45 = arith.constant 0.000000e+00 : f32
    %101 = vector.broadcast %cst_45 : f32 to vector<32x256xf32>
    %102 = arith.maximumf %100, %101 : vector<32x256xf32>
    %c0_46 = arith.constant 0 : index
    %c0_47 = arith.constant 0 : index
    %103 = vector.load %arg11[%c0_46, %c0_47] : memref<32x256xf32, #tpu.memory_space<vmem>>, vector<32x256xf32>
    tpu.vector_store %arg11[%c0_46, %c0_47], %102 {strides = array<i32>} : memref<32x256xf32, #tpu.memory_space<vmem>>, vector<32x256xf32>,
    return
  }
}

</mosaic_0001>

<bundles_post_ra>
// kernel: st_gcnn_layer.1
= control target key start
LH: loop header
LB: loop body
LE: loop exit
PB: predicated region body
PF: predicated region fallthrough
CT: control target
= control target key end

     0   :  { %v1063_v0 = vmov 0   ;;  %v1064_v6 = vmov 0.0|0.0   ;;  %vm1065_vm0 = vmmov 0   ;;  %v1066_v11 = vmov 0.0   ;;  %s1576_s3 = inlined_call_operand.vmem [shape: f32[3,32,1], index: 3, kind: input, shape index: {}]   ;;  %s1577_s1 = inlined_call_operand.vmem [shape: f32[128,128], index: 1, kind: input, shape index: {}]   ;;  %s1578_s7 = inlined_call_operand.vmem [shape: f32[3,32,1], index: 7, kind: input, shape index: {}]   ;;  %s1579_s0 = inlined_call_operand.vmem [shape: f32[3,256], index: 0, kind: input, shape index: {}]   ;;  %s1580_s4 = inlined_call_operand.vmem [shape: f32[32,1], index: 4, kind: input, shape index: {}]   ;;  %s1581_s8 = inlined_call_operand.vmem [shape: f32[32,1], index: 8, kind: input, shape index: {}]   ;;  %s1582_s2 = inlined_call_operand.vmem [shape: f32[1,256], index: 2, kind: input, shape index: {}]   ;;  %s1583_s6 = inlined_call_operand.vmem [shape: f32[32,1], index: 6, kind: input, shape index: {}]   ;;  %s1584_s10 = inlined_call_operand.vmem [shape: f32[32,1], index: 10, kind: input, shape index: {}]   ;;  %s1585_s9 = inlined_call_operand.vmem [shape: f32[32,1], index: 9, kind: input, shape index: {}]   ;;  %s1586_s5 = inlined_call_operand.vmem [shape: f32[32,1], index: 5, kind: input, shape index: {}]   ;;  %s1587_s11 = inlined_call_operand.vmem [shape: f32[32,256], index: 11, kind: output, shape index: {}]  }
   0x1   :  { %1045 = vset.pattern.permute.xlu1 %v1063_v0  ;;  %1044 = vset.pattern.permute.xlu0 %v1063_v0  ;;  %v200_v1 = vld [vmem:[%s1576_s3 + $0x10] sm:$0xff]  ;;  %v198_v2 = vld [vmem:[%s1576_s3] sm:$0xff]  ;;  %v40_v4 = vld [vmem:[%s1577_s1 + $0x8] sm:$0xff] }
   0x2   :  { %v39_v3 = vld [vmem:[%s1577_s1] sm:$0xff]  ;;  %214 = vperm.xlu1 %1045, %v200_v1   ;;  %204 = vperm.xlu0 %1044, %v198_v2   ;;  %v201_v5 = vld [vmem:[%s1576_s3 + $0x18] sm:$0xff]  ;;  %v199_v8 = vld [vmem:[%s1576_s3 + $0x8] sm:$0xff] }
   0x3   :  { %992 = vmatprep.subr.bf16.mxu0 %v1064_v6  ;;  %1016 = vmatprep.subr.bf16.mxu1 %v1064_v6  ;;  %v993_v7 = vpack.c.bf16 %v40_v4, %v39_v3  ;;  %v41_v9 = vld [vmem:[%s1577_s1 + $0x10] sm:$0xff]  ;;  %v42_v10 = vld [vmem:[%s1577_s1 + $0x18] sm:$0xff]  ;;  %v43_v13 = vld [vmem:[%s1577_s1 + $0x20] sm:$0xff]  ;;  %v222_v3 = vlaneseq }
   0x4   :  { %954 = vmatprep.mubr.msk.f32.mxu0 %vm1065_vm0, %v1066_v11  ;;  %989 = vmatprep.mubr.msk.f32.mxu1 %vm1065_vm0, %v1066_v11  ;;  %v996_v12 = vpack.c.bf16 %v42_v10, %v41_v9  ;;  %v44_v14 = vld [vmem:[%s1577_s1 + $0x28] sm:$0xff]  ;;  %v872_v16 = vld [vmem:[%s1576_s3 + $0x20] sm:$0xff]  ;;  %v45_v18 = vld [vmem:[%s1577_s1 + $0x30] sm:$0xff] }
   0x5   :  { %994 = vmatpush3.bf16.msra.mxu0 %v993_v7  ;;  %1018 = vmatpush3.bf16.msra.mxu1 %v993_v7  ;;  %v873_v15 = vld [vmem:[%s1576_s3 + $0x28] sm:$0xff]  ;;  %v999_v17 = vpack.c.bf16 %v44_v14, %v43_v13  ;;  %v46_v19 = vld [vmem:[%s1577_s1 + $0x38] sm:$0xff]  ;;  %v874_v21 = vld [vmem:[%s1576_s3 + $0x30] sm:$0xff] }
   0x6   :  { %219 = vperm.xlu1 %1045, %v201_v5   ;;  %209 = vperm.xlu0 %1044, %v199_v8   ;;  %v875_v20 = vld [vmem:[%s1576_s3 + $0x38] sm:$0xff]  ;;  %v1002_v22 = vpack.c.bf16 %v46_v19, %v45_v18  ;;  %v47_v23 = vld [vmem:[%s1577_s1 + $0x40] sm:$0xff]  ;;  %v48_v24 = vld [vmem:[%s1577_s1 + $0x48] sm:$0xff] }
   0x7   :  { %995 = vmatprep.subr.bf16.mxu0 %v1064_v6  ;;  %1019 = vmatprep.subr.bf16.mxu1 %v1064_v6  ;;  %v877_v25 = vld [vmem:[%s1576_s3 + $0x48] sm:$0xff]  ;;  %v876_v26 = vld [vmem:[%s1576_s3 + $0x40] sm:$0xff]  ;;  %v1005_v27 = vpack.c.bf16 %v48_v24, %v47_v23  ;;  %v49_v28 = vld [vmem:[%s1577_s1 + $0x50] sm:$0xff] }
   0x8   :  { %v50_v29 = vld [vmem:[%s1577_s1 + $0x58] sm:$0xff]  ;;  %v878_v31 = vld [vmem:[%s1576_s3 + $0x50] sm:$0xff]  ;;  %v51_v33 = vld [vmem:[%s1577_s1 + $0x60] sm:$0xff] }
   0x9   :  { %997 = vmatpush3.bf16.msra.mxu0 %v996_v12  ;;  %1021 = vmatpush3.bf16.msra.mxu1 %v996_v12  ;;  %v879_v30 = vld [vmem:[%s1576_s3 + $0x58] sm:$0xff]  ;;  %v1008_v32 = vpack.c.bf16 %v50_v29, %v49_v28  ;;  %v52_v34 = vld [vmem:[%s1577_s1 + $0x68] sm:$0xff]  ;;  %v520_v36 = vld [vmem:[%s1578_s7] sm:$0xff] }
   0xa   :  { %250 = vperm.xlu1 %1045, %v873_v15   ;;  %245 = vperm.xlu0 %1044, %v872_v16   ;;  %v521_v35 = vld [vmem:[%s1578_s7 + $0x8] sm:$0xff]  ;;  %v1011_v37 = vpack.c.bf16 %v52_v34, %v51_v33  ;;  %v53_v38 = vld [vmem:[%s1577_s1 + $0x70] sm:$0xff]  ;;  %v54_v39 = vld [vmem:[%s1577_s1 + $0x78] sm:$0xff] }
   0xb   :  { %998 = vmatprep.subr.bf16.mxu0 %v1064_v6  ;;  %1022 = vmatprep.subr.bf16.mxu1 %v1064_v6  ;;  %v523_v40 = vld [vmem:[%s1578_s7 + $0x18] sm:$0xff]  ;;  %v522_v41 = vld [vmem:[%s1578_s7 + $0x10] sm:$0xff]  ;;  %v1014_v42 = vpack.c.bf16 %v54_v39, %v53_v38  ;;  %v1240_v43 = vld [vmem:[%s1579_s0] sm:$0x77] }
   0xc   :  { %v881_v44 = vld [vmem:[%s1578_s7 + $0x28] sm:$0xff]  ;;  %v880_v45 = vld [vmem:[%s1578_s7 + $0x20] sm:$0xff]  ;;  %v126_v46 = vcombine.high %v1240_v43, %v1240_v43  ;;  %v883_v47 = vld [vmem:[%s1578_s7 + $0x38] sm:$0xff] }
   0xd   :  { %1000 = vmatpush3.bf16.msra.mxu0 %v999_v17  ;;  %1024 = vmatpush3.bf16.msra.mxu1 %v999_v17  ;;  %v882_v48 = vld [vmem:[%s1578_s7 + $0x30] sm:$0xff]  ;;  %v337_v49 = vld [vmem:[%s1580_s4 + $0x8] sm:$0xff]  ;;  %v336_v50 = vld [vmem:[%s1580_s4] sm:$0xff] }
   0xe   :  { %260 = vperm.xlu1 %1045, %v875_v20   ;;  %255 = vperm.xlu0 %1044, %v874_v21   ;;  %v339_v51 = vld [vmem:[%s1580_s4 + $0x18] sm:$0xff]  ;;  %v338_v52 = vld [vmem:[%s1580_s4 + $0x10] sm:$0xff]  ;;  %v885_v53 = vld [vmem:[%s1578_s7 + $0x48] sm:$0xff] }
   0xf   :  { %1001 = vmatprep.subr.bf16.mxu0 %v1064_v6  ;;  %1025 = vmatprep.subr.bf16.mxu1 %v1064_v6  ;;  %v884_v54 = vld [vmem:[%s1578_s7 + $0x40] sm:$0xff]  ;;  %v887_v55 = vld [vmem:[%s1578_s7 + $0x58] sm:$0xff]  ;;  %v886_v56 = vld [vmem:[%s1578_s7 + $0x50] sm:$0xff] }
  0x10   :  { %v689_v57 = vld [vmem:[%s1581_s8 + $0x8] sm:$0xff]  ;;  %v688_v58 = vld [vmem:[%s1581_s8] sm:$0xff]  ;;  %v691_v59 = vld [vmem:[%s1581_s8 + $0x18] sm:$0xff] }
  0x11   :  { %1003 = vmatpush3.bf16.msra.mxu0 %v1002_v22  ;;  %1027 = vmatpush3.bf16.msra.mxu1 %v1002_v22  ;;  %v690_v60 = vld [vmem:[%s1581_s8 + $0x10] sm:$0xff] }
  0x12   :  { %299 = vperm.xlu1 %1045, %v877_v25   ;;  %294 = vperm.xlu0 %1044, %v876_v26  }
  0x13   :  { %1004 = vmatprep.subr.bf16.mxu0 %v1064_v6  ;;  %1028 = vmatprep.subr.bf16.mxu1 %v1064_v6 }
  0x15   :  { %1006 = vmatpush3.bf16.msra.mxu0 %v1005_v27  ;;  %1030 = vmatpush3.bf16.msra.mxu1 %v1005_v27 }
  0x16   :  { %309 = vperm.xlu1 %1045, %v879_v30   ;;  %304 = vperm.xlu0 %1044, %v878_v31  }
  0x17   :  { %1007 = vmatprep.subr.bf16.mxu0 %v1064_v6  ;;  %1031 = vmatprep.subr.bf16.mxu1 %v1064_v6 }
  0x19   :  { %1009 = vmatpush3.bf16.msra.mxu0 %v1008_v32  ;;  %1033 = vmatpush3.bf16.msra.mxu1 %v1008_v32 }
  0x1a   :  { %531 = vperm.xlu1 %1045, %v521_v35   ;;  %526 = vperm.xlu0 %1044, %v520_v36  }
  0x1b   :  { %1010 = vmatprep.subr.bf16.mxu0 %v1064_v6  ;;  %1034 = vmatprep.subr.bf16.mxu1 %v1064_v6 }
  0x1d   :  { %1012 = vmatpush3.bf16.msra.mxu0 %v1011_v37  ;;  %1036 = vmatpush3.bf16.msra.mxu1 %v1011_v37 }
  0x1e   :  { %541 = vperm.xlu1 %1045, %v523_v40   ;;  %536 = vperm.xlu0 %1044, %v522_v41  }
  0x1f   :  { %1013 = vmatprep.subr.bf16.mxu0 %v1064_v6  ;;  %1037 = vmatprep.subr.bf16.mxu1 %v1064_v6  ;;  %v223_v6 = vshrl.u32 %v222_v3, 7 }
  0x21   :  { %1015 = vmatpush3.bf16.msra.mxu0 %v1014_v42  ;;  %1039 = vmatpush3.bf16.msra.mxu1 %v1014_v42  ;;  %v1315_v9 = vsub.s32 0, %v223_v6  ;;  %v550_v10 = vsub.s32 4, %v223_v6  ;;  %v1326_v19 = vsub.s32 1, %v223_v6  ;;  %v601_v20 = vsub.s32 5, %v223_v6 }
  0x22   :  { %582 = vperm.xlu1 %1045, %v881_v44   ;;  %577 = vperm.xlu0 %1044, %v880_v45   ;;  %v1333_v35 = vsub.s32 2, %v223_v6  ;;  %v660_v36 = vsub.s32 6, %v223_v6 }
  0x23   :  { %v547_v13 = vrot.slane %v1240_v43, %v1315_v9  ;;  %v551_v14 = vrot.slane %v1240_v43, %v550_v10  ;;  %v598_v27 = vrot.slane %v1240_v43, %v1326_v19  ;;  %v602_v28 = vrot.slane %v1240_v43, %v601_v20 }
  0x24   :  { %955 = vmatmul.mubr.f32.vlgmr.msra.gmra.mrb[0].mxu0 %v1240_v43  ;;  %990 = vmatmul.mubr.f32.vlgmr.msra.gmra.mrb[0].mxu1 %v126_v46 }
  0x25   :  { %v557_v17 = vrot.slane %v547_v13, %v1315_v9  ;;  %v561_v18 = vrot.slane %v551_v14, %v1315_v9  ;;  %v608_v31 = vrot.slane %v598_v27, %v1326_v19  ;;  %v612_v32 = vrot.slane %v602_v28, %v1326_v19 }
  0x26   :  { %592 = vperm.xlu1 %1045, %v883_v47   ;;  %587 = vperm.xlu0 %1044, %v882_v48   ;;  %v657_v48 = vrot.slane %v1240_v43, %v1333_v35 }
  0x2a   :  { %348 = vperm.xlu1 %1045, %v337_v49   ;;  %343 = vperm.xlu0 %1044, %v336_v50   ;;  %v661_v49 = vrot.slane %v1240_v43, %v660_v36 }
  0x2c   :  { %v671_v3 = vrot.slane %v661_v49, %v1333_v35 }
  0x2e   :  { %358 = vperm.xlu1 %1045, %v339_v51   ;;  %353 = vperm.xlu0 %1044, %v338_v52  }
  0x32   :  { %641 = vperm.xlu1 %1045, %v885_v53   ;;  %636 = vperm.xlu0 %1044, %v884_v54  }
  0x36   :  { %651 = vperm.xlu1 %1045, %v887_v55   ;;  %646 = vperm.xlu0 %1044, %v886_v56  }
  0x3a   :  { %699 = vperm.xlu1 %1045, %v689_v57   ;;  %694 = vperm.xlu0 %1044, %v688_v58  }
  0x3e   :  { %709 = vperm.xlu1 %1045, %v691_v59   ;;  %704 = vperm.xlu0 %1044, %v690_v60   ;;  %v667_v60 = vrot.slane %v657_v48, %v1333_v35 }
  0x81   :  { %v1295_v61 = vpop.permute.xlu1 %214  ;;  %v1297_v62 = vpop.permute.xlu0 %204 }
  0x85   :  { %v1299_v63 = vpop.permute.xlu1 %219  ;;  %v1301_v0 = vpop.permute.xlu0 %209 }
  0x89   :  { %v1303_v1 = vpop.permute.xlu1 %250  ;;  %v1305_v2 = vpop.permute.xlu0 %245 }
  0x8d   :  { %v1307_v4 = vpop.permute.xlu1 %260  ;;  %v1309_v5 = vpop.permute.xlu0 %255 }
  0x91   :  { %v1311_v7 = vpop.permute.xlu1 %299  ;;  %v1313_v8 = vpop.permute.xlu0 %294 }
  0x95   :  { %v1317_v11 = vpop.permute.xlu1 %309  ;;  %v1319_v12 = vpop.permute.xlu0 %304 }
  0x99   :  { %v532_v15 = vpop.permute.xlu1 %531  ;;  %v527_v16 = vpop.permute.xlu0 %526 }
  0x9a   :  { %v564_v50 = vmul.f32 %v557_v17, %v532_v15  ;;  %v565_v51 = vmul.f32 %v561_v18, %v532_v15  ;;  %v562_v52 = vmul.f32 %v557_v17, %v527_v16  ;;  %v563_v53 = vmul.f32 %v561_v18, %v527_v16 }
  0x9d   :  { %v542_v21 = vpop.permute.xlu1 %541  ;;  %v537_v22 = vpop.permute.xlu0 %536 }
  0x9e   :  { %v568_v23 = vmul.f32 %v557_v17, %v542_v21  ;;  %v569_v24 = vmul.f32 %v561_v18, %v542_v21  ;;  %v566_v25 = vmul.f32 %v557_v17, %v537_v22  ;;  %v567_v26 = vmul.f32 %v561_v18, %v537_v22 }
  0xa1   :  { %v583_v29 = vpop.permute.xlu1 %582  ;;  %v578_v30 = vpop.permute.xlu0 %577 }
  0xa2   :  { %v615_v54 = vmul.f32 %v608_v31, %v583_v29  ;;  %v616_v55 = vmul.f32 %v612_v32, %v583_v29  ;;  %v613_v56 = vmul.f32 %v608_v31, %v578_v30  ;;  %v614_v57 = vmul.f32 %v612_v32, %v578_v30 }
  0xa4   :  { %v623_v6 = vadd.f32 %v615_v54, %v564_v50  ;;  %v624_v10 = vadd.f32 %v616_v55, %v565_v51  ;;  %v621_v13 = vadd.f32 %v613_v56, %v562_v52  ;;  %v622_v14 = vadd.f32 %v614_v57, %v563_v53 }
  0xa5   :  { %v593_v33 = vpop.permute.xlu1 %592  ;;  %v588_v34 = vpop.permute.xlu0 %587 }
  0xa6   :  { %v619_v37 = vmul.f32 %v608_v31, %v593_v33  ;;  %v620_v38 = vmul.f32 %v612_v32, %v593_v33  ;;  %v617_v39 = vmul.f32 %v608_v31, %v588_v34  ;;  %v618_v40 = vmul.f32 %v612_v32, %v588_v34 }
  0xa8   :  { %v627_v41 = vadd.f32 %v619_v37, %v568_v23  ;;  %v628_v42 = vadd.f32 %v620_v38, %v569_v24  ;;  %v625_v44 = vadd.f32 %v617_v39, %v566_v25  ;;  %v626_v45 = vadd.f32 %v618_v40, %v567_v26 }
  0xa9   :  { %v349_v46 = vpop.permute.xlu1 %348  ;;  %v344_v47 = vpop.permute.xlu0 %343 }
  0xad   :  { %v1338_v58 = vpop.permute.xlu1 %358  ;;  %v354_v59 = vpop.permute.xlu0 %353 }
  0xb1   :  { %v642_v43 = vpop.permute.xlu1 %641  ;;  %v637_v20 = vpop.permute.xlu0 %636 }
  0xb2   :  { %v674_v15 = vmul.f32 %v667_v60, %v642_v43  ;;  %v675_v17 = vmul.f32 %v671_v3, %v642_v43  ;;  %v672_v16 = vmul.f32 %v667_v60, %v637_v20  ;;  %v673_v18 = vmul.f32 %v671_v3, %v637_v20 }
  0xb4   :  { %v682_v23 = vadd.f32 %v674_v15, %v623_v6  ;;  %v683_v24 = vadd.f32 %v675_v17, %v624_v10  ;;  %v680_v25 = vadd.f32 %v672_v16, %v621_v13  ;;  %v681_v26 = vadd.f32 %v673_v18, %v622_v14 }
  0xb5   :  { %v652_v21 = vpop.permute.xlu1 %651  ;;  %v647_v22 = vpop.permute.xlu0 %646 }
  0xb6   :  { %v678_v27 = vmul.f32 %v667_v60, %v652_v21  ;;  %v679_v28 = vmul.f32 %v671_v3, %v652_v21  ;;  %v676_v29 = vmul.f32 %v667_v60, %v647_v22  ;;  %v677_v30 = vmul.f32 %v671_v3, %v647_v22 }
  0xb8   :  { %v1342_v31 = vadd.f32 %v678_v27, %v627_v41  ;;  %v1344_v32 = vadd.f32 %v679_v28, %v628_v42  ;;  %v684_v33 = vadd.f32 %v676_v29, %v625_v44  ;;  %v1346_v34 = vadd.f32 %v677_v30, %v626_v45  ;;  %v340_v42 = vld [vmem:[%s1582_s2] sm:$0x3] }
  0xb9   :  { %v700_v36 = vpop.permute.xlu1 %699  ;;  %v695_v37 = vpop.permute.xlu0 %694  ;;  %v1364_v44 = vrot.slane %v340_v42, %v1315_v9  ;;  %v1367_v45 = vrot.slane %v340_v42, %v1326_v19 }
  0xba   :  { %v1348_v38 = vadd.f32 %v700_v36, %v682_v23  ;;  %v1350_v39 = vadd.f32 %v700_v36, %v683_v24  ;;  %v1352_v40 = vadd.f32 %v695_v37, %v680_v25  ;;  %v1354_v48 = vadd.f32 %v695_v37, %v681_v26 }
  0xbb   :  { %v374_v50 = vmul.f32 %v1364_v44, %v349_v46  ;;  %v375_v52 = vmul.f32 %v1367_v45, %v349_v46  ;;  %v372_v53 = vmul.f32 %v1364_v44, %v344_v47  ;;  %v373_v54 = vmul.f32 %v1367_v45, %v344_v47 }
  0xbc   :  { %v731_v49 = vadd.f32 %v1350_v39, %v1348_v38  ;;  %v728_v41 = vadd.f32 %v1354_v48, %v1352_v40  ;;  %v376_v55 = vmul.f32 %v1364_v44, %v354_v59  ;;  %v377_v46 = vmul.f32 %v1367_v45, %v354_v59 }
  0xbd   :  { %v705_v51 = vpop.permute.xlu0 %704 }
  0xbe   :  { %732 = vadd.xlane.f32.xlu0 %v731_v49  ;;  %729 = vadd.xlane.f32.xlu1 %v728_v41  ;;  %v1379_v43 = vadd.f32 %v705_v51, %v684_v33 }
  0xf7   :  { %v121_v56 = vpop.f32.mrb[0].mxu0  ;;  %v194_v57 = vpop.f32.mrb[0].mxu1 }
  0xf8   :  { %v225_v60 = vrot.slane %v121_v56, %v1315_v9  ;;  %v266_v3 = vrot.slane %v121_v56, %v1326_v19  ;;  %v315_v6 = vrot.slane %v121_v56, %v1333_v35  ;;  %v229_v10 = vrot.slane %v194_v57, %v1315_v9  ;;  %v956_v13 = vpop.f32.mrb[1].mxu0  ;;  %v991_v14 = vpop.f32.mrb[1].mxu1 }
  0xf9   :  { %v270_v47 = vrot.slane %v194_v57, %v1326_v19  ;;  %v319_v20 = vrot.slane %v194_v57, %v1333_v35 }
  0xfa   :  { %v232_v15 = vmul.f32 %v225_v60, %v1301_v0  ;;  %v233_v17 = vmul.f32 %v229_v10, %v1301_v0  ;;  %v273_v16 = vmul.f32 %v266_v3, %v1303_v1  ;;  %v322_v18 = vmul.f32 %v315_v6, %v1311_v7 }
  0xfb   :  { %v274_v9 = vmul.f32 %v270_v47, %v1303_v1  ;;  %v323_v21 = vmul.f32 %v319_v20, %v1311_v7  ;;  %v230_v59 = vmul.f32 %v225_v60, %v1297_v62  ;;  %v231_v22 = vmul.f32 %v229_v10, %v1297_v62 }
  0xfc   :  { %v281_v23 = vadd.f32 %v273_v16, %v232_v15  ;;  %v271_v19 = vmul.f32 %v266_v3, %v1305_v2  ;;  %v272_v35 = vmul.f32 %v270_v47, %v1305_v2  ;;  %v320_v24 = vmul.f32 %v315_v6, %v1313_v8 }
  0xfd   :  { %v282_v0 = vadd.f32 %v274_v9, %v233_v17  ;;  %v321_v25 = vmul.f32 %v319_v20, %v1313_v8  ;;  %v234_v26 = vmul.f32 %v225_v60, %v1295_v61  ;;  %v235_v1 = vmul.f32 %v229_v10, %v1295_v61 }
  0xfe   :  { %v330_v27 = vadd.f32 %v322_v18, %v281_v23  ;;  %v279_v7 = vadd.f32 %v271_v19, %v230_v59  ;;  %v280_v28 = vadd.f32 %v272_v35, %v231_v22  ;;  %v275_v29 = vmul.f32 %v266_v3, %v1309_v5 }
  0xff   :  { %v331_v62 = vadd.f32 %v323_v21, %v282_v0  ;;  %v276_v30 = vmul.f32 %v270_v47, %v1309_v5  ;;  %v324_v33 = vmul.f32 %v315_v6, %v1319_v12  ;;  %v325_v2 = vmul.f32 %v319_v20, %v1319_v12 }
 0x100   :  { %v382_v36 = vadd.f32 %v374_v50, %v330_v27  ;;  %v328_v37 = vadd.f32 %v320_v24, %v279_v7  ;;  %v329_v49 = vadd.f32 %v321_v25, %v280_v28  ;;  %v283_v8 = vadd.f32 %v275_v29, %v234_v26 }
 0x101   :  { %v383_v41 = vadd.f32 %v375_v52, %v331_v62  ;;  %v284_v42 = vadd.f32 %v276_v30, %v235_v1  ;;  %v236_v61 = vmul.f32 %v225_v60, %v1299_v63  ;;  %v237_v56 = vmul.f32 %v229_v10, %v1299_v63 }
 0x102   :  { %v380_v57 = vadd.f32 %v372_v53, %v328_v37  ;;  %v381_v13 = vadd.f32 %v373_v54, %v329_v49  ;;  %v332_v14 = vadd.f32 %v324_v33, %v283_v8  ;;  %v277_v15 = vmul.f32 %v266_v3, %v1307_v4 }
 0x103   :  { %v1405_v5 = vadd.f32 %v705_v51, %v1346_v34  ;;  %v399_v17 = vadd.f32 %v383_v41, %v382_v36  ;;  %v333_v12 = vadd.f32 %v325_v2, %v284_v42  ;;  %v278_v50 = vmul.f32 %v270_v47, %v1307_v4 }
 0x104   :  { %v396_v16 = vadd.f32 %v381_v13, %v380_v57  ;;  %v384_v18 = vadd.f32 %v376_v55, %v332_v14  ;;  %v285_v52 = vadd.f32 %v277_v15, %v236_v61  ;;  %v326_v9 = vmul.f32 %v315_v6, %v1317_v11  ;;  %v710_v6 = vpop.permute.xlu1 %709 }
 0x105   :  { %400 = vadd.xlane.f32.xlu1 %v399_v17  ;;  %v385_v60 = vadd.f32 %v377_v46, %v333_v12  ;;  %v286_v63 = vadd.f32 %v278_v50, %v237_v56  ;;  %v327_v53 = vmul.f32 %v319_v20, %v1317_v11  ;;  %v378_v54 = vmul.f32 %v1364_v44, %v1338_v58 }
 0x106   :  { %397 = vadd.xlane.f32.xlu0 %v396_v16  ;;  %v334_v34 = vadd.f32 %v326_v9, %v285_v52  ;;  %v379_v51 = vmul.f32 %v1367_v45, %v1338_v58  ;;  %v734_v4 = vadd.f32 %v1405_v5, %v1379_v43  ;;  %v718_v11 = vadd.f32 %v710_v6, %v1342_v31 }
 0x107   :  { %v335_v55 = vadd.f32 %v327_v53, %v286_v63  ;;  %v402_v3 = vadd.f32 %v385_v60, %v384_v18  ;;  %v719_v47 = vadd.f32 %v710_v6, %v1344_v32  ;;  %v725_v6 = vld [vmem:[%s1584_s10 + $0x8] sm:$0xff] }
 0x108   :  { %v386_v10 = vadd.f32 %v378_v54, %v334_v34 }
 0x109   :  { %735 = vadd.xlane.f32.xlu1 %v734_v4  ;;  %v387_v46 = vadd.f32 %v379_v51, %v335_v55  ;;  %v737_v20 = vadd.f32 %v719_v47, %v718_v11 }
 0x10a   :  { %403 = vadd.xlane.f32.xlu0 %v402_v3  ;;  %v393_v3 = vld [vmem:[%s1583_s6 + $0x8] sm:$0xff] }
 0x10b   :  { %v405_v44 = vadd.f32 %v387_v46, %v386_v10 }
 0x10e   :  { %406 = vadd.xlane.f32.xlu0 %v405_v44 }
 0x112   :  { %738 = vadd.xlane.f32.xlu0 %v737_v20 }
 0x14b   :  { %v733_v21 = vpop.xlane.xlu0 %732  ;;  %v730_v58 = vpop.xlane.xlu1 %729 }
 0x14c   :  { %v741_v45 = vmul.f32 0.00390625, %v733_v21  ;;  %v740_v59 = vmul.f32 0.00390625, %v730_v58 }
 0x14e   :  { %v1419_v22 = vsub.f32 %v1348_v38, %v741_v45  ;;  %v1422_v23 = vsub.f32 %v1350_v39, %v741_v45  ;;  %v1425_v19 = vsub.f32 %v1352_v40, %v740_v59  ;;  %v1428_v31 = vsub.f32 %v1354_v48, %v740_v59 }
 0x150   :  { %v752_v32 = vmul.f32 %v1425_v19, %v1425_v19  ;;  %v753_v35 = vmul.f32 %v1428_v31, %v1428_v31  ;;  %v754_v24 = vmul.f32 %v1419_v22, %v1419_v22  ;;  %v755_v38 = vmul.f32 %v1422_v23, %v1422_v23 }
 0x152   :  { %v760_v39 = vadd.f32 %v753_v35, %v752_v32  ;;  %v763_v0 = vadd.f32 %v755_v38, %v754_v24  ;;  %v720_v32 = vld [vmem:[%s1585_s9] sm:$0xff]  ;;  %v721_v35 = vld [vmem:[%s1585_s9 + $0x8] sm:$0xff] }
 0x154   :  { %761 = vadd.xlane.f32.xlu1 %v760_v39  ;;  %764 = vadd.xlane.f32.xlu0 %v763_v0 }
 0x192   :  { %v401_v40 = vpop.xlane.xlu1 %400 }
 0x193   :  { %v409_v25 = vmul.f32 0.00390625, %v401_v40  ;;  %v398_v48 = vpop.xlane.xlu0 %397 }
 0x194   :  { %v408_v26 = vmul.f32 0.00390625, %v398_v48 }
 0x195   :  { %v1438_v1 = vsub.f32 %v382_v36, %v409_v25  ;;  %v1440_v27 = vsub.f32 %v383_v41, %v409_v25 }
 0x196   :  { %v1442_v7 = vsub.f32 %v380_v57, %v408_v26  ;;  %v1444_v28 = vsub.f32 %v381_v13, %v408_v26  ;;  %v736_v29 = vpop.xlane.xlu1 %735 }
 0x197   :  { %v742_v62 = vmul.f32 0.00390625, %v736_v29  ;;  %v404_v30 = vpop.xlane.xlu0 %403  ;;  %v422_v33 = vmul.f32 %v1438_v1, %v1438_v1  ;;  %v423_v2 = vmul.f32 %v1440_v27, %v1440_v27 }
 0x198   :  { %v410_v37 = vmul.f32 0.00390625, %v404_v30  ;;  %v420_v36 = vmul.f32 %v1442_v7, %v1442_v7  ;;  %v421_v49 = vmul.f32 %v1444_v28, %v1444_v28 }
 0x199   :  { %v1455_v8 = vsub.f32 %v1379_v43, %v742_v62  ;;  %v431_v41 = vadd.f32 %v423_v2, %v422_v33  ;;  %v1458_v42 = vsub.f32 %v1405_v5, %v742_v62 }
 0x19a   :  { %v1460_v61 = vsub.f32 %v384_v18, %v410_v37  ;;  %v1462_v56 = vsub.f32 %v385_v60, %v410_v37  ;;  %v428_v57 = vadd.f32 %v421_v49, %v420_v36 }
 0x19b   :  { %v407_v13 = vpop.xlane.xlu0 %406  ;;  %432 = vadd.xlane.f32.xlu0 %v431_v41  ;;  %v756_v17 = vmul.f32 %v1455_v8, %v1455_v8  ;;  %v757_v16 = vmul.f32 %v1458_v42, %v1458_v42 }
 0x19c   :  { %v411_v14 = vmul.f32 0.00390625, %v407_v13  ;;  %429 = vadd.xlane.f32.xlu1 %v428_v57  ;;  %v424_v15 = vmul.f32 %v1460_v61, %v1460_v61  ;;  %v425_v43 = vmul.f32 %v1462_v56, %v1462_v56 }
 0x19d   :  { %v766_v54 = vadd.f32 %v757_v16, %v756_v17 }
 0x19e   :  { %v1470_v5 = vsub.f32 %v386_v10, %v411_v14  ;;  %v1472_v12 = vsub.f32 %v387_v46, %v411_v14  ;;  %v434_v50 = vadd.f32 %v425_v43, %v424_v15  ;;  %v395_v10 = vld [vmem:[%s1583_s6 + $0x18] sm:$0xff]  ;;  %v392_v46 = vld [vmem:[%s1583_s6] sm:$0xff]  ;;  %v722_v43 = vld [vmem:[%s1585_s9 + $0x10] sm:$0xff] }
 0x19f   :  { %v739_v18 = vpop.xlane.xlu0 %738 }
 0x1a0   :  { %v743_v52 = vmul.f32 0.00390625, %v739_v18  ;;  %435 = vadd.xlane.f32.xlu1 %v434_v50  ;;  %v426_v9 = vmul.f32 %v1470_v5, %v1470_v5  ;;  %v427_v60 = vmul.f32 %v1472_v12, %v1472_v12 }
 0x1a2   :  { %v1480_v63 = vsub.f32 %v718_v11, %v743_v52  ;;  %v1482_v53 = vsub.f32 %v719_v47, %v743_v52  ;;  %v437_v34 = vadd.f32 %v427_v60, %v426_v9  ;;  %v394_v11 = vld [vmem:[%s1583_s6 + $0x10] sm:$0xff]  ;;  %v724_v47 = vld [vmem:[%s1584_s10] sm:$0xff]  ;;  %v389_v52 = vld [vmem:[%s1586_s5 + $0x8] sm:$0xff] }
 0x1a3   :  { %v723_v9 = vld [vmem:[%s1585_s9 + $0x18] sm:$0xff] }
 0x1a4   :  { %767 = vadd.xlane.f32.xlu1 %v766_v54  ;;  %438 = vadd.xlane.f32.xlu0 %v437_v34  ;;  %v758_v51 = vmul.f32 %v1480_v63, %v1480_v63  ;;  %v759_v4 = vmul.f32 %v1482_v53, %v1482_v53 }
 0x1a6   :  { %v769_v55 = vadd.f32 %v759_v4, %v758_v51  ;;  %v388_v4 = vld [vmem:[%s1586_s5] sm:$0xff] }
 0x1a8   :  { %770 = vadd.xlane.f32.xlu0 %v769_v55  ;;  %v726_v55 = vld [vmem:[%s1584_s10 + $0x10] sm:$0xff] }
 0x1b5   :  { %491 = vperm.xlu1 %1045, %v393_v3  }
 0x1b9   :  { %501 = vperm.xlu1 %1045, %v395_v10  }
 0x1bd   :  { %823 = vperm.xlu1 %1045, %v725_v6   ;;  %v390_v6 = vld [vmem:[%s1586_s5 + $0x10] sm:$0xff] }
 0x1be   :  { %486 = vperm.xlu0 %1044, %v392_v46  }
 0x1c2   :  { %496 = vperm.xlu0 %1044, %v394_v11  }
 0x1c6   :  { %818 = vperm.xlu0 %1044, %v724_v47   ;;  %v391_v47 = vld [vmem:[%s1586_s5 + $0x18] sm:$0xff] }
 0x1e1   :  { %v762_v44 = vpop.xlane.xlu1 %761  ;;  %v765_v20 = vpop.xlane.xlu0 %764 }
 0x1e2   :  { %v772_v21 = vmul.f32 0.00390625, %v762_v44  ;;  %v773_v58 = vmul.f32 0.00390625, %v765_v20  ;;  %v727_v20 = vld [vmem:[%s1584_s10 + $0x18] sm:$0xff] }
 0x1e4   :  { %v776_v45 = vadd.f32 1e-05, %v772_v21  ;;  %v777_v59 = vadd.f32 1e-05, %v773_v58 }
 0x1e6   :  { %1047 = vrsqrt.f32 %v776_v45 }
 0x1e7   :  { %1049 = vrsqrt.f32 %v777_v59 }
 0x1f0   :  { %v1048_v24 = vpop.eup %1047 }
 0x1f1   :  { %v1050_v38 = vpop.eup %1049  ;;  %v784_v39 = vmul.f32 %v1048_v24, %v720_v32 }
 0x1f2   :  { %v785_v0 = vmul.f32 %v1050_v38, %v721_v35 }
 0x1f3   :  { %790 = vperm.xlu0 %1044, %v784_v39  }
 0x1f4   :  { %795 = vperm.xlu1 %1045, %v785_v0  }
 0x228   :  { %v433_v25 = vpop.xlane.xlu0 %432 }
 0x229   :  { %v430_v40 = vpop.xlane.xlu1 %429  ;;  %v441_v26 = vmul.f32 0.00390625, %v433_v25 }
 0x22a   :  { %v440_v33 = vmul.f32 0.00390625, %v430_v40 }
 0x22b   :  { %v445_v2 = vadd.f32 1e-05, %v441_v26 }
 0x22c   :  { %v444_v41 = vadd.f32 1e-05, %v440_v33 }
 0x22d   :  { %v436_v48 = vpop.xlane.xlu1 %435 }
 0x22e   :  { %v442_v57 = vmul.f32 0.00390625, %v436_v48 }
 0x230   :  { %v446_v14 = vadd.f32 1e-05, %v442_v57 }
 0x231   :  { %v768_v29 = vpop.xlane.xlu1 %767  ;;  %v439_v62 = vpop.xlane.xlu0 %438 }
 0x232   :  { %v774_v30 = vmul.f32 0.00390625, %v768_v29  ;;  %v443_v15 = vmul.f32 0.00390625, %v439_v62 }
 0x234   :  { %v778_v37 = vadd.f32 1e-05, %v774_v30  ;;  %v447_v50 = vadd.f32 1e-05, %v443_v15 }
 0x235   :  { %v771_v36 = vpop.xlane.xlu0 %770  ;;  %v492_v58 = vpop.permute.xlu1 %491 }
 0x236   :  { %1051 = vrsqrt.f32 %v778_v37  ;;  %v775_v49 = vmul.f32 0.00390625, %v771_v36 }
 0x237   :  { %1053 = vrsqrt.f32 %v445_v2 }
 0x238   :  { %v779_v13 = vadd.f32 1e-05, %v775_v49 }
 0x239   :  { %v502_v59 = vpop.permute.xlu1 %501 }
 0x23a   :  { %1055 = vrsqrt.f32 %v779_v13 }
 0x23b   :  { %1057 = vrsqrt.f32 %v444_v41 }
 0x23c   :  { %1059 = vrsqrt.f32 %v446_v14 }
 0x23d   :  { %1061 = vrsqrt.f32 %v447_v50  ;;  %v487_v21 = vpop.permute.xlu0 %486  ;;  %v824_v35 = vpop.permute.xlu1 %823 }
 0x240   :  { %v1052_v17 = vpop.eup %1051 }
 0x241   :  { %v786_v16 = vmul.f32 %v1052_v17, %v722_v43  ;;  %v1054_v18 = vpop.eup %1053  ;;  %v497_v45 = vpop.permute.xlu0 %496 }
 0x242   :  { %v453_v54 = vmul.f32 %v1054_v18, %v389_v52 }
 0x243   :  { %800 = vperm.xlu0 %1044, %v786_v16  }
 0x244   :  { %v1056_v60 = vpop.eup %1055 }
 0x245   :  { %v787_v34 = vmul.f32 %v1056_v60, %v723_v9  ;;  %v1058_v51 = vpop.eup %1057  ;;  %v819_v32 = vpop.permute.xlu0 %818 }
 0x246   :  { %v452_v3 = vmul.f32 %v1058_v51, %v388_v4  ;;  %v1060_v10 = vpop.eup %1059 }
 0x247   :  { %463 = vperm.xlu0 %1044, %v453_v54   ;;  %805 = vperm.xlu1 %1045, %v787_v34   ;;  %v454_v46 = vmul.f32 %v1060_v10, %v390_v6  ;;  %v1062_v11 = vpop.eup %1061 }
 0x248   :  { %v455_v44 = vmul.f32 %v1062_v11, %v391_v47 }
 0x24b   :  { %828 = vperm.xlu0 %1044, %v726_v55   ;;  %458 = vperm.xlu1 %1045, %v452_v3  }
 0x24f   :  { %468 = vperm.xlu1 %1045, %v454_v46  }
 0x253   :  { %473 = vperm.xlu1 %1045, %v455_v44  }
 0x257   :  { %833 = vperm.xlu1 %1045, %v727_v20  }
 0x272   :  { %v791_v24 = vpop.permute.xlu0 %790 }
 0x273   :  { %v796_v38 = vpop.permute.xlu1 %795  ;;  %v808_v37 = vmul.f32 %v791_v24, %v1425_v19  ;;  %v809_v36 = vmul.f32 %v791_v24, %v1428_v31 }
 0x274   :  { %v810_v0 = vmul.f32 %v796_v38, %v1419_v22  ;;  %v811_v40 = vmul.f32 %v796_v38, %v1422_v23 }
 0x275   :  { %v837_v43 = vadd.f32 %v819_v32, %v809_v36 }
 0x276   :  { %v838_v33 = vadd.f32 %v824_v35, %v810_v0  ;;  %v839_v2 = vadd.f32 %v824_v35, %v811_v40 }
 0x2c2   :  { %v801_v39 = vpop.permute.xlu0 %800 }
 0x2c3   :  { %v812_v60 = vmul.f32 %v801_v39, %v1455_v8  ;;  %v813_v54 = vmul.f32 %v801_v39, %v1458_v42 }
 0x2c6   :  { %v806_v25 = vpop.permute.xlu1 %805  ;;  %v464_v48 = vpop.permute.xlu0 %463 }
 0x2c7   :  { %v478_v26 = vmul.f32 %v464_v48, %v1438_v1  ;;  %v479_v29 = vmul.f32 %v464_v48, %v1440_v27  ;;  %v836_v27 = vadd.f32 %v819_v32, %v808_v37  ;;  %v814_v47 = vmul.f32 %v806_v25, %v1480_v63 }
 0x2c8   :  { %v815_v44 = vmul.f32 %v806_v25, %v1482_v53 }
 0x2c9   :  { %v506_v62 = vadd.f32 %v492_v58, %v478_v26  ;;  %v507_v30 = vadd.f32 %v492_v58, %v479_v29 }
 0x2ca   :  { %v459_v49 = vpop.permute.xlu1 %458  ;;  %v829_v9 = vpop.permute.xlu0 %828 }
 0x2cb   :  { %v514_v41 = vmax.f32 %v506_v62, 0.0  ;;  %v515_v57 = vmax.f32 %v507_v30, 0.0  ;;  %v476_v22 = vmul.f32 %v459_v49, %v1442_v7  ;;  %v477_v23 = vmul.f32 %v459_v49, %v1444_v28 }
 0x2cc   :  { %v840_v10 = vadd.f32 %v829_v9, %v812_v60  ;;  %v841_v6 = vadd.f32 %v829_v9, %v813_v54 }
 0x2cd   :  { %v846_v13 = vadd.f32 %v838_v33, %v514_v41  ;;  %v847_v14 = vadd.f32 %v839_v2, %v515_v57  ;;  %v504_v1 = vadd.f32 %v487_v21, %v476_v22  ;;  %v505_v15 = vadd.f32 %v487_v21, %v477_v23 }
 0x2ce   :  { %v469_v17 = vpop.permute.xlu1 %468 }
 0x2cf   :  { %v854_v50 = vmax.f32 %v846_v13, 0.0  ;;  %v855_v16 = vmax.f32 %v847_v14, 0.0  ;;  %v512_v18 = vmax.f32 %v504_v1, 0.0  ;;  %v513_v19 = vmax.f32 %v505_v15, 0.0 }
 0x2d0   :  { %v480_v31 = vmul.f32 %v469_v17, %v1460_v61  ;;  %v481_v52 = vmul.f32 %v469_v17, %v1462_v56 }
 0x2d1   :  { %862 = vst [vmem:[%s1587_s11 + $0x10] sm:$0xff] %v854_v50  ;;  %863 = vst [vmem:[%s1587_s11 + $0x18] sm:$0xff] %v855_v16  ;;  %v844_v7 = vadd.f32 %v836_v27, %v512_v18  ;;  %v845_v28 = vadd.f32 %v837_v43, %v513_v19 }
 0x2d2   :  { %v508_v34 = vadd.f32 %v497_v45, %v480_v31  ;;  %v509_v51 = vadd.f32 %v497_v45, %v481_v52  ;;  %v474_v61 = vpop.permute.xlu1 %473 }
 0x2d3   :  { %v852_v4 = vmax.f32 %v844_v7, 0.0  ;;  %v853_v56 = vmax.f32 %v845_v28, 0.0  ;;  %v482_v55 = vmul.f32 %v474_v61, %v1470_v5  ;;  %v483_v3 = vmul.f32 %v474_v61, %v1472_v12 }
 0x2d4   :  { %v516_v46 = vmax.f32 %v508_v34, 0.0  ;;  %v517_v11 = vmax.f32 %v509_v51, 0.0 }
 0x2d5   :  { %860 = vst [vmem:[%s1587_s11] sm:$0xff] %v852_v4  ;;  %861 = vst [vmem:[%s1587_s11 + $0x8] sm:$0xff] %v853_v56  ;;  %v510_v8 = vadd.f32 %v502_v59, %v482_v55  ;;  %v511_v42 = vadd.f32 %v502_v59, %v483_v3 }
 0x2d6   :  { %v848_v5 = vadd.f32 %v840_v10, %v516_v46  ;;  %v849_v12 = vadd.f32 %v841_v6, %v517_v11  ;;  %v834_v20 = vpop.permute.xlu1 %833 }
 0x2d7   :  { %v518_v21 = vmax.f32 %v510_v8, 0.0  ;;  %v519_v58 = vmax.f32 %v511_v42, 0.0  ;;  %v842_v45 = vadd.f32 %v834_v20, %v814_v47  ;;  %v843_v32 = vadd.f32 %v834_v20, %v815_v44 }
 0x2d8   :  { %v856_v63 = vmax.f32 %v848_v5, 0.0  ;;  %v857_v35 = vmax.f32 %v849_v12, 0.0 }
 0x2d9   :  { %v850_v53 = vadd.f32 %v842_v45, %v518_v21  ;;  %v851_v24 = vadd.f32 %v843_v32, %v519_v58 }
 0x2da   :  { %864 = vst [vmem:[%s1587_s11 + $0x20] sm:$0xff] %v856_v63  ;;  %865 = vst [vmem:[%s1587_s11 + $0x28] sm:$0xff] %v857_v35 }
 0x2db   :  { %v858_v59 = vmax.f32 %v850_v53, 0.0  ;;  %v859_v38 = vmax.f32 %v851_v24, 0.0 }
 0x2dd   :  { %866 = vst [vmem:[%s1587_s11 + $0x30] sm:$0xff] %v858_v59  ;;  %867 = vst [vmem:[%s1587_s11 + $0x38] sm:$0xff] %v859_v38 }

</bundles_post_ra>
